<compile_context>
chip_gen: v6e
topology: v6e:2x2x1
jax: 0.10.0
libtpu: 0.0.40
codegen_flags: <defaults>
</compile_context>

<pallas_src>
import jax
import jax.numpy as jnp
from jax.experimental import pallas as pl
from jax.experimental.pallas import tpu as pltpu


def _pick_rows_tile(R, NC, pred_isz, tgt_isz, count_labels,
                    target_pred_bytes=2 << 20, vmem_budget_bytes=16 << 20,
                    max_rows=8192):
    """Rows (of 128 lanes) per grid step.

    Large enough that the ~0.35us per-step overhead hides behind >=~2MB of
    streamed logits, small enough that double-buffered input blocks, the f32
    accumulators and the compiler-managed f32 intermediates fit a conservative
    VMEM budget (safe for v7x's 64 MiB/TC; plenty of slack on v5e/v6e).
    """
    if R <= 32:
        return R                                   # single full-extent block
    n_acc = 2 if count_labels else 1
    row_pred = NC * 128 * pred_isz
    want = max(32, target_pred_bytes // max(row_pred, 1))
    per_row = (2 * 128 * (NC * pred_isz + tgt_isz)  # double-buffered inputs
               + n_acc * 128 * 4                    # resident accumulators
               + 6 * 128 * 4)                       # f32 intermediates (m/e/den/num/...)
    cap = max(32, vmem_budget_bytes // per_row)
    rt = int(min(want, cap, R, max_rows))
    return max(32, (rt // 32) * 32)                 # dense for f32/bf16/int8 tiles


def _make_kernel(NC, rows_tile, R, count_labels):
    need_row_mask = (R % rows_tile) != 0            # only when the last block is partial

    def kernel(pred_ref, tgt_ref, *rest):
        if count_labels:
            inter_ref, cnt_ref, acc_i, acc_c = rest
        else:
            inter_ref, acc_i = rest
            cnt_ref = acc_c = None

        j = pl.program_id(1)

        # Batch axis is "parallel": init/finalize depend only on the spatial axis.
        @pl.when(j == 0)
        def _init():
            acc_i[...] = jnp.zeros_like(acc_i)
            if count_labels:
                acc_c[...] = jnp.zeros_like(acc_c)

        t = tgt_ref[0].astype(jnp.int32)             # (rows_tile, 128) labels

        # Unrolled class loop over dense (rows_tile, 128) slabs: elementwise
        # max / exp / add on VPU+EUP, one-hot via scalar class compare.
        m = pred_ref[0, 0].astype(jnp.float32)
        for c in range(1, NC):
            m = jnp.maximum(m, pred_ref[0, c].astype(jnp.float32))

        den = None
        num = None
        for c in range(NC):
            e_c = jnp.exp(pred_ref[0, c].astype(jnp.float32) - m)
            den = e_c if den is None else den + e_c
            sel = jnp.where(t == c, e_c, 0.0)
            num = sel if num is None else num + sel

        contrib = num / den                          # softmax[label], never full softmax

        if count_labels:
            cnt = ((t >= 0) & (t < NC)).astype(jnp.float32)

        if need_row_mask:
            # Partial last row-block: rows >= R hold garbage (possibly NaN) —
            # zero their contribution.  All-true on non-final blocks.
            rows = j * rows_tile + jax.lax.broadcasted_iota(
                jnp.int32, (rows_tile, 128), 0)
            ok = rows < R
            contrib = jnp.where(ok, contrib, 0.0)
            if count_labels:
                cnt = jnp.where(ok, cnt, 0.0)

        acc_i[...] += contrib
        if count_labels:
            acc_c[...] += cnt

        @pl.when(j == pl.num_programs(1) - 1)
        def _finalize():
            inter_ref[...] = jnp.sum(acc_i[...], axis=0, keepdims=True)[None]
            if count_labels:
                cnt_ref[...] = jnp.sum(acc_c[...], axis=0, keepdims=True)[None]

    return kernel


def dice_loss(pred, target, smooth: float = 1e-7, log_loss: bool = False,
              rows_tile=None, assume_valid_labels: bool = True):
    """pred: (N, NC, D, H, W) float logits; target: (N, D, H, W) int labels."""
    N, NC = pred.shape[0], pred.shape[1]
    S = 1
    for d in pred.shape[2:]:
        S *= d
    count_labels = not assume_valid_labels

    pred_isz = pred.dtype.itemsize
    tgt_dtype = jnp.int8 if NC <= 127 else jnp.int32
    tgt_isz = 1 if NC <= 127 else 4

    R = pl.cdiv(S, 128)
    pred3 = pred.reshape(N, NC, S)
    tgt2 = target.astype(tgt_dtype).reshape(N, S)
    if S != R * 128:
        # TODO(synk): this pads (one HBM copy of) the logits; only hit when
        # D*H*W is not a multiple of 128.  Padded lanes carry label -1 so they
        # contribute exactly zero in-kernel and card uses the original S.
        pad = R * 128 - S
        pred3 = jnp.pad(pred3, ((0, 0), (0, 0), (0, pad)))
        tgt2 = jnp.pad(tgt2, ((0, 0), (0, pad)), constant_values=-1)

    pred4 = pred3.reshape(N, NC, R, 128)     # spatial axis on (sublanes, lanes)
    tgt3 = tgt2.reshape(N, R, 128)

    if rows_tile is None:
        rows_tile = _pick_rows_tile(R, NC, pred_isz, tgt_isz, count_labels)
    rows_tile = int(rows_tile)
    assert rows_tile == R or (rows_tile % 8 == 0 and rows_tile <= R), rows_tile
    n_row_tiles = pl.cdiv(R, rows_tile)

    kernel = _make_kernel(NC, rows_tile, R, count_labels)

    part_shape = jax.ShapeDtypeStruct((N, 1, 128), jnp.float32)
    part_spec = pl.BlockSpec((1, 1, 128), lambda i, j: (i, 0, 0))
    if count_labels:
        out_shape = (part_shape, part_shape)
        out_specs = (part_spec, part_spec)
    else:
        out_shape = part_shape
        out_specs = part_spec

    n_acc = 2 if count_labels else 1
    scratch = [pltpu.VMEM((rows_tile, 128), jnp.float32) for _ in range(n_acc)]

    # Padding-aware VMEM accounting: rows padded up to the int8/bf16 sublane
    # multiple (32); include the compiler-managed f32 tile intermediates.
    pad_rows = ((max(rows_tile, 8) + 31) // 32) * 32
    vmem_need = (2 * pad_rows * 128 * (NC * pred_isz + tgt_isz)
                 + (n_acc + 6) * pad_rows * 128 * 4
                 + (256 << 10))
    vmem_limit = int(min(40 << 20, max(20 << 20, int(vmem_need * 1.5))))

    outs = pl.pallas_call(
        kernel,
        out_shape=out_shape,
        grid_spec=pltpu.PrefetchScalarGridSpec(
            num_scalar_prefetch=0,
            grid=(N, n_row_tiles),
            in_specs=[
                pl.BlockSpec((1, NC, rows_tile, 128), lambda i, j: (i, 0, j, 0)),
                pl.BlockSpec((1, rows_tile, 128), lambda i, j: (i, j, 0)),
            ],
            out_specs=out_specs,
            scratch_shapes=scratch,
        ),
        compiler_params=pltpu.CompilerParams(
            dimension_semantics=("parallel", "arbitrary"),
            vmem_limit_bytes=vmem_limit),
    )(pred4, tgt3)

    if count_labels:
        inter_part, cnt_part = outs
        onehot_sum = jnp.sum(cnt_part)
    else:
        inter_part = outs
        # one_hot(labels) sums to one per voxel when labels are valid.
        onehot_sum = jnp.float32(N * S)

    inter_s = jnp.sum(inter_part)
    # sum(softmax) over every voxel is exactly the voxel count.
    card_s = jnp.float32(N * S) + onehot_sum
    dice_score = 2.0 * (inter_s + smooth) / (card_s + smooth)
    if log_loss:
        return -jnp.log(dice_score)
    return 1.0 - dice_score


def _dice_loss_ref(pred, target, smooth=1e-7, log_loss=False):
    """Pure-JAX reference matching the PyTorch module semantics."""
    n, nc = pred.shape[0], pred.shape[1]
    onehot = jax.nn.one_hot(target, nc, dtype=jnp.float32)        # (N,D,H,W,NC)
    onehot = jnp.transpose(onehot, (0, 4, 1, 2, 3))               # (N,NC,D,H,W)
    sm = jax.nn.softmax(pred.astype(jnp.float32), axis=1)
    sm = sm.reshape(n, nc, -1)
    onehot = onehot.reshape(n, nc, -1)
    inter = jnp.sum(sm * onehot)
    card = jnp.sum(sm + onehot)
    dice_score = 2.0 * (inter + smooth) / (card + smooth)
    return -jnp.log(dice_score) if log_loss else 1.0 - dice_score


if __name__ == "__main__":
    key = jax.random.PRNGKey(0)
    kp, kt = jax.random.split(key)

    # Base case: N=2, NC=4, S=256 (R=2 rows of 128 lanes, single spatial tile).
    N, NC, D, H, W = 2, 4, 4, 8, 8
    pred = jax.random.normal(kp, (N, NC, D, H, W), dtype=jnp.float32)
    target = jax.random.randint(kt, (N, D, H, W), 0, NC, dtype=jnp.int32)

    loss = jax.block_until_ready(dice_loss(pred, target))
    ref = _dice_loss_ref(pred, target)
    assert jnp.allclose(loss, ref, atol=1e-5, rtol=1e-5), (loss, ref)

    # log-loss variant
    loss_log = jax.block_until_ready(dice_loss(pred, target, log_loss=True))
    ref_log = _dice_loss_ref(pred, target, log_loss=True)
    assert jnp.allclose(loss_log, ref_log, atol=1e-5, rtol=1e-5), (loss_log, ref_log)

    # In-kernel one-hot counting path (no valid-label assumption).
    loss_cnt = jax.block_until_ready(
        dice_loss(pred, target, assume_valid_labels=False))
    assert jnp.allclose(loss_cnt, ref, atol=1e-5, rtol=1e-5), (loss_cnt, ref)

    # bf16 logits (halved HBM traffic); reference on the same rounded values.
    pred_bf16 = pred.astype(jnp.bfloat16)
    loss_bf16 = jax.block_until_ready(dice_loss(pred_bf16, target))
    ref_bf16 = _dice_loss_ref(pred_bf16.astype(jnp.float32), target)
    assert jnp.allclose(loss_bf16, ref_bf16, atol=1e-5, rtol=1e-5), (loss_bf16, ref_bf16)

    # Ragged spatial size (S=192 not a multiple of 128): pad + label=-1 path.
    D2, H2, W2 = 3, 8, 8
    pred2 = jax.random.normal(kp, (N, NC, D2, H2, W2), dtype=jnp.float32)
    target2 = jax.random.randint(kt, (N, D2, H2, W2), 0, NC, dtype=jnp.int32)
    loss2 = jax.block_until_ready(dice_loss(pred2, target2))
    ref2 = _dice_loss_ref(pred2, target2)
    assert jnp.allclose(loss2, ref2, atol=1e-5, rtol=1e-5), (loss2, ref2)

    # Row-tiled grid with a partial last block (R=50 rows, rows_tile=32).
    N3, NC3, D3, H3, W3 = 2, 3, 4, 40, 40        # S = 6400
    pred3_ = jax.random.normal(kp, (N3, NC3, D3, H3, W3), dtype=jnp.float32)
    target3_ = jax.random.randint(kt, (N3, D3, H3, W3), 0, NC3, dtype=jnp.int32)
    loss3 = jax.block_until_ready(dice_loss(pred3_, target3_, rows_tile=32))
    ref3 = _dice_loss_ref(pred3_, target3_)
    assert jnp.allclose(loss3, ref3, atol=1e-5, rtol=1e-5), (loss3, ref3)

    print("KERNEL_OK")
</pallas_src>

<mosaic_0001>
module attributes {stable_mosaic.version = 11 : i64} {
  func.func @kernel(%arg0: i32, %arg1: i32, %arg2: memref<1x4x2x128xf32, #tpu.memory_space<vmem>>, %arg3: memref<1x2x128xi8, #tpu.memory_space<vmem>>, %arg4: memref<1x1x128xf32, #tpu.memory_space<vmem>>, %arg5: memref<2x128xf32, #tpu.memory_space<vmem>>) attributes {dimension_semantics = [#tpu.dimension_semantics<parallel>, #tpu.dimension_semantics<arbitrary>], iteration_bounds = array<i64: 2, 1>, scalar_prefetch = 0 : i64, scratch_operands = 1 : i64, tpu.core_type = #tpu.core_type<tc>, window_params = [{transform_indices = @transform_0, window_bounds = array<i64: 1, 4, 2, 128>}, {transform_indices = @transform_1, window_bounds = array<i64: 1, 2, 128>}, {transform_indices = @transform_2, window_bounds = array<i64: 1, 1, 128>}]} {
    %c0_i32 = arith.constant 0 : i32
    %0 = arith.cmpi eq, %arg1, %c0_i32 : i32
    %1 = arith.extui %0 : i1 to i32
    %c0_i32_0 = arith.constant 0 : i32
    %2 = arith.cmpi ne, %1, %c0_i32_0 : i32
    scf.if %2 {
      %cst_42 = arith.constant 0.000000e+00 : f32
      %62 = vector.broadcast %cst_42 : f32 to vector<2x128xf32>
      %c0_43 = arith.constant 0 : index
      %c0_44 = arith.constant 0 : index
      %63 = vector.load %arg5[%c0_43, %c0_44] : memref<2x128xf32, #tpu.memory_space<vmem>>, vector<2x128xf32>
      tpu.vector_store %arg5[%c0_43, %c0_44], %62 {strides = array<i32>} : memref<2x128xf32, #tpu.memory_space<vmem>>, vector<2x128xf32>,
    } else {
    }
    %c0 = arith.constant 0 : index
    %c0_1 = arith.constant 0 : index
    %c0_2 = arith.constant 0 : index
    %3 = vector.load %arg3[%c0, %c0_1, %c0_2] : memref<1x2x128xi8, #tpu.memory_space<vmem>>, vector<1x2x128xi8>
    %4 = vector.shape_cast %3 : vector<1x2x128xi8> to vector<2x128xi8>
    %5 = arith.extsi %4 : vector<2x128xi8> to vector<2x128xi32>
    %c0_3 = arith.constant 0 : index
    %c0_4 = arith.constant 0 : index
    %c0_5 = arith.constant 0 : index
    %c0_6 = arith.constant 0 : index
    %6 = vector.load %arg2[%c0_3, %c0_4, %c0_5, %c0_6] : memref<1x4x2x128xf32, #tpu.memory_space<vmem>>, vector<1x1x2x128xf32>
    %7 = vector.shape_cast %6 : vector<1x1x2x128xf32> to vector<2x128xf32>
    %c0_7 = arith.constant 0 : index
    %c1 = arith.constant 1 : index
    %c0_8 = arith.constant 0 : index
    %c0_9 = arith.constant 0 : index
    %8 = vector.load %arg2[%c0_7, %c1, %c0_8, %c0_9] : memref<1x4x2x128xf32, #tpu.memory_space<vmem>>, vector<1x1x2x128xf32>
    %9 = vector.shape_cast %8 : vector<1x1x2x128xf32> to vector<2x128xf32>
    %10 = arith.maximumf %7, %9 : vector<2x128xf32>
    %c0_10 = arith.constant 0 : index
    %c2 = arith.constant 2 : index
    %c0_11 = arith.constant 0 : index
    %c0_12 = arith.constant 0 : index
    %11 = vector.load %arg2[%c0_10, %c2, %c0_11, %c0_12] : memref<1x4x2x128xf32, #tpu.memory_space<vmem>>, vector<1x1x2x128xf32>
    %12 = vector.shape_cast %11 : vector<1x1x2x128xf32> to vector<2x128xf32>
    %13 = arith.maximumf %10, %12 : vector<2x128xf32>
    %c0_13 = arith.constant 0 : index
    %c3 = arith.constant 3 : index
    %c0_14 = arith.constant 0 : index
    %c0_15 = arith.constant 0 : index
    %14 = vector.load %arg2[%c0_13, %c3, %c0_14, %c0_15] : memref<1x4x2x128xf32, #tpu.memory_space<vmem>>, vector<1x1x2x128xf32>
    %15 = vector.shape_cast %14 : vector<1x1x2x128xf32> to vector<2x128xf32>
    %16 = arith.maximumf %13, %15 : vector<2x128xf32>
    %c0_16 = arith.constant 0 : index
    %c0_17 = arith.constant 0 : index
    %c0_18 = arith.constant 0 : index
    %c0_19 = arith.constant 0 : index
    %17 = vector.load %arg2[%c0_16, %c0_17, %c0_18, %c0_19] : memref<1x4x2x128xf32, #tpu.memory_space<vmem>>, vector<1x1x2x128xf32>
    %18 = vector.shape_cast %17 : vector<1x1x2x128xf32> to vector<2x128xf32>
    %19 = arith.subf %18, %16 : vector<2x128xf32>
    %20 = math.exp %19 : vector<2x128xf32>
    %c0_i32_20 = arith.constant 0 : i32
    %21 = vector.broadcast %c0_i32_20 : i32 to vector<2x128xi32>
    %22 = arith.cmpi eq, %5, %21 : vector<2x128xi32>
    %cst = arith.constant 0.000000e+00 : f32
    %23 = vector.broadcast %cst : f32 to vector<2x128xf32>
    %24 = arith.select %22, %20, %23 : vector<2x128xi1>, vector<2x128xf32>
    %c0_21 = arith.constant 0 : index
    %c1_22 = arith.constant 1 : index
    %c0_23 = arith.constant 0 : index
    %c0_24 = arith.constant 0 : index
    %25 = vector.load %arg2[%c0_21, %c1_22, %c0_23, %c0_24] : memref<1x4x2x128xf32, #tpu.memory_space<vmem>>, vector<1x1x2x128xf32>
    %26 = vector.shape_cast %25 : vector<1x1x2x128xf32> to vector<2x128xf32>
    %27 = arith.subf %26, %16 : vector<2x128xf32>
    %28 = math.exp %27 : vector<2x128xf32>
    %29 = arith.addf %20, %28 : vector<2x128xf32>
    %c1_i32 = arith.constant 1 : i32
    %30 = vector.broadcast %c1_i32 : i32 to vector<2x128xi32>
    %31 = arith.cmpi eq, %5, %30 : vector<2x128xi32>
    %cst_25 = arith.constant 0.000000e+00 : f32
    %32 = vector.broadcast %cst_25 : f32 to vector<2x128xf32>
    %33 = arith.select %31, %28, %32 : vector<2x128xi1>, vector<2x128xf32>
    %34 = arith.addf %24, %33 : vector<2x128xf32>
    %c0_26 = arith.constant 0 : index
    %c2_27 = arith.constant 2 : index
    %c0_28 = arith.constant 0 : index
    %c0_29 = arith.constant 0 : index
    %35 = vector.load %arg2[%c0_26, %c2_27, %c0_28, %c0_29] : memref<1x4x2x128xf32, #tpu.memory_space<vmem>>, vector<1x1x2x128xf32>
    %36 = vector.shape_cast %35 : vector<1x1x2x128xf32> to vector<2x128xf32>
    %37 = arith.subf %36, %16 : vector<2x128xf32>
    %38 = math.exp %37 : vector<2x128xf32>
    %39 = arith.addf %29, %38 : vector<2x128xf32>
    %c2_i32 = arith.constant 2 : i32
    %40 = vector.broadcast %c2_i32 : i32 to vector<2x128xi32>
    %41 = arith.cmpi eq, %5, %40 : vector<2x128xi32>
    %cst_30 = arith.constant 0.000000e+00 : f32
    %42 = vector.broadcast %cst_30 : f32 to vector<2x128xf32>
    %43 = arith.select %41, %38, %42 : vector<2x128xi1>, vector<2x128xf32>
    %44 = arith.addf %34, %43 : vector<2x128xf32>
    %c0_31 = arith.constant 0 : index
    %c3_32 = arith.constant 3 : index
    %c0_33 = arith.constant 0 : index
    %c0_34 = arith.constant 0 : index
    %45 = vector.load %arg2[%c0_31, %c3_32, %c0_33, %c0_34] : memref<1x4x2x128xf32, #tpu.memory_space<vmem>>, vector<1x1x2x128xf32>
    %46 = vector.shape_cast %45 : vector<1x1x2x128xf32> to vector<2x128xf32>
    %47 = arith.subf %46, %16 : vector<2x128xf32>
    %48 = math.exp %47 : vector<2x128xf32>
    %49 = arith.addf %39, %48 : vector<2x128xf32>
    %c3_i32 = arith.constant 3 : i32
    %50 = vector.broadcast %c3_i32 : i32 to vector<2x128xi32>
    %51 = arith.cmpi eq, %5, %50 : vector<2x128xi32>
    %cst_35 = arith.constant 0.000000e+00 : f32
    %52 = vector.broadcast %cst_35 : f32 to vector<2x128xf32>
    %53 = arith.select %51, %48, %52 : vector<2x128xi1>, vector<2x128xf32>
    %54 = arith.addf %44, %53 : vector<2x128xf32>
    %55 = arith.divf %54, %49 : vector<2x128xf32>
    %c0_36 = arith.constant 0 : index
    %c0_37 = arith.constant 0 : index
    %56 = vector.load %arg5[%c0_36, %c0_37] : memref<2x128xf32, #tpu.memory_space<vmem>>, vector<2x128xf32>
    %57 = arith.addf %56, %55 : vector<2x128xf32>
    %c0_38 = arith.constant 0 : index
    %c0_39 = arith.constant 0 : index
    %58 = vector.load %arg5[%c0_38, %c0_39] : memref<2x128xf32, #tpu.memory_space<vmem>>, vector<2x128xf32>
    tpu.vector_store %arg5[%c0_38, %c0_39], %57 {strides = array<i32>} : memref<2x128xf32, #tpu.memory_space<vmem>>, vector<2x128xf32>,
    %c0_i32_40 = arith.constant 0 : i32
    %59 = arith.cmpi eq, %arg1, %c0_i32_40 : i32
    %60 = arith.extui %59 : i1 to i32
    %c0_i32_41 = arith.constant 0 : i32
    %61 = arith.cmpi ne, %60, %c0_i32_41 : i32
    scf.if %61 {
      %c0_42 = arith.constant 0 : index
      %c0_43 = arith.constant 0 : index
      %62 = vector.load %arg5[%c0_42, %c0_43] : memref<2x128xf32, #tpu.memory_space<vmem>>, vector<2x128xf32>
      %cst_44 = arith.constant dense<0.000000e+00> : vector<128xf32>
      %63 = vector.multi_reduction <add>, %62, %cst_44 [0] : vector<2x128xf32> to vector<128xf32>
      %64 = vector.shape_cast %63 : vector<128xf32> to vector<1x128xf32>
      %65 = vector.shape_cast %64 : vector<1x128xf32> to vector<1x1x128xf32>
      %c0_45 = arith.constant 0 : index
      %c0_46 = arith.constant 0 : index
      %c0_47 = arith.constant 0 : index
      %66 = vector.load %arg4[%c0_45, %c0_46, %c0_47] : memref<1x1x128xf32, #tpu.memory_space<vmem>>, vector<1x1x128xf32>
      tpu.vector_store %arg4[%c0_45, %c0_46, %c0_47], %65 {strides = array<i32>} : memref<1x1x128xf32, #tpu.memory_space<vmem>>, vector<1x1x128xf32>,
    } else {
    }
    return
  }
  func.func @transform_0(%arg0: i32, %arg1: i32) -> (i32, i32, i32, i32) {
    %c0_i32 = arith.constant 0 : i32
    %c0_i32_0 = arith.constant 0 : i32
    %c0_i32_1 = arith.constant 0 : i32
    return %arg0, %c0_i32, %arg1, %c0_i32_0 : i32, i32, i32, i32
  }
  func.func @transform_1(%arg0: i32, %arg1: i32) -> (i32, i32, i32) {
    %c0_i32 = arith.constant 0 : i32
    %c0_i32_0 = arith.constant 0 : i32
    return %arg0, %arg1, %c0_i32 : i32, i32, i32
  }
  func.func @transform_2(%arg0: i32, %arg1: i32) -> (i32, i32, i32) {
    %c0_i32 = arith.constant 0 : i32
    %c0_i32_0 = arith.constant 0 : i32
    %c0_i32_1 = arith.constant 0 : i32
    return %arg0, %c0_i32, %c0_i32_0 : i32, i32, i32
  }
}

</mosaic_0001>

<bundles_post_ra>
// kernel: tpu_custom_call.1
= control target key start
LH: loop header
LB: loop body
LE: loop exit
PB: predicated region body
PF: predicated region fallthrough
CT: control target
= control target key end

     0   :  { %7 = vsyncpa [#allocation4], 0  ;;  %s807_s0 = inlined_call_operand.hbm [shape: f32[2,4,2,128], index: 0, kind: input, shape index: {}]   ;;  %s808_s1 = inlined_call_operand.hbm [shape: s8[2,2,128], index: 1, kind: input, shape index: {}]   ;;  %s809_s2 = inlined_call_operand.hbm [shape: f32[2,1,128], index: 2, kind: output, shape index: {}]  }
   0x1   :  { %9 = vsyncpa [#allocation4 + $0x1], 0 }
   0x2   :  { %10 = vsyncpa [#allocation7], 0 }
   0x3   :  { %12 = vsyncpa [#allocation7 + $0x1], 0 }
   0x4   :  { %13 = vsyncpa [#allocation5], 0 }
   0x5   :  { %15 = vsyncpa [#allocation5 + $0x1], 0  ;;  %s644_s9 = smov 0   ;;  %s646_s10 = smov 0  }
   0x6   :  { %s648_s11 = smov 0   ;;  %s650_s12 = smov 0  }
   0x7   :  { %s652_s13 = smov 0   ;;  %s654_s14 = smov 0  }
   0x8 LB: > { %s384_s15 = sadd.s32 4294967295, %s621_s14   ;;  %s385_s16 = sadd.s32 4294967294, %s621_s14   ;;  %s621_s14 = sphi %s654_s14, %s21_s14   ;;  %s617_s13 = sphi %s652_s13, %s821_s13   ;;  %s613_s12 = sphi %s650_s12, %s820_s12   ;;  %s609_s11 = sphi %s648_s11, %s819_s11   ;;  %s605_s10 = sphi %s646_s10, %s818_s10   ;;  %s601_s9 = sphi %s644_s9, %s817_s9  }
   0x9   : > { %s33_s17 = sadd.s32 1, %s617_s13  ;;  %s42_s18 = sadd.s32 1, %s609_s11 }
   0xa   : > { %p35_p0 = scmp.ge.s32.totalorder %s33_s17, 2  ;;  %p49_p1 = scmp.ne.s32.totalorder %s609_s11, %s605_s10 }
   0xb   : > { %p50_p2 = scmp.eq.s32.totalorder %s621_s14, 0  ;;  %p55_p3 = scmp.ne.s32.totalorder %s605_s10, %s601_s9 }
   0xc   : > { %s823_s17 = smov (%p35_p0, %s33_s17), 0  ;;  %p56_p5 = scmp.eq.s32.totalorder %s384_s15, 0 }
   0xd   : > { %p685_p4 = por %p50_p2, %p49_p1  ;;  %s37_s20 = ssub.s32 %s617_s13, %s823_s17 }
   0xe   : > { %p107_p6 = scmp.eq.s32.totalorder %s384_s15, 1  ;;  %p40_p7 = scmp.eq.s32.totalorder %s37_s20, 0 }
   0xf   : > { %p691_p8 = por %p56_p5, %p55_p3  ;;  %p113_p10 = scmp.eq.s32.totalorder %s385_s16, 1 }
  0x10   : > { %p695_p9 = por %p107_p6, %p49_p1  ;;  %p418_p13 = scmp.lt.s32.totalorder %s621_s14, 2 }
  0x11   : > { %s700_s23 = scalar_select %p40_p7, %s609_s11, %s42_s18  }
  0x12   : > { %p702_p11 = por %p113_p10, %p55_p3  ;;  %s709_s25 = sand.u32 1, %s609_s11  }
  0x13   : > { %s388_s26 = sshll.u32 %s709_s25, 3  ;;  %s400_s27 = sshll.u32 %s617_s13, 7 }
  0x14   : > { %s144_s30 = scalar_lea.hbm %s807_s0, %s400_s27  ;;  %s137_s3 = scalar_lea.vmem [#allocation3], %s388_s26 }
  0x15   : > { %s145_s4 = sshll.u32 %s137_s3, 4  ;;  %p718_p0 = pnand %p418_p13, %p685_p4  ;;  %s146_s4 = int_to_ptr.vmem [resolvable:$true] %s145_s4 }
  0x16   : > { %p392_p1 = scmp.ge.s32.totalorder %s621_s14, 1  ;;  %s134_s6 = scalar_lea.sflag [#allocation4], %s709_s25 }
  0x17   : > { %p483_p2 = pneg %p718_p0  ;;  %s494_s7 = scalar_lea.vmem %s146_s4, 128 }
  0x18   : > { %p495_p3 = scmp.ne.s32.totalorder %s146_s4, %s494_s7  ;;  %s623_s8 = smov [#allocation3]  }
  0x19   : > { %s499_s15 = sshll.u32 %s623_s8, 4  ;;  %s500_s15 = int_to_ptr.vmem [resolvable:$false] %s499_s15 }
  0x1a   : > { %p497_p5 = pnand %p495_p3, %p483_p2  ;;  %s501_s16 = scalar_lea.vmem %s500_s15, 256 }
  0x1b   : > { %p502_p4 = scmp.lt.s32.totalorder %s146_s4, %s500_s15  ;;  %p503_p7 = scmp.lt.s32.totalorder %s501_s16, %s494_s7 }
  0x1c   : > { %p498_p6 = pneg %p497_p5 }
  0x1d   : > { %p504_p10 = por %p503_p7, %p502_p4 }
  0x1f   : > { %p505_p13 = pnand %p504_p10, %p498_p6 }
  0x21   : > { %508 = shalt.err (!%p505_p13)
}
  0x22   : > { %s624_s18 = smov 32   ;;  %s625_s19 = smov 2  }
  0x23   : > { %410 = dma.hbm_to_vmem [thread:$0]  (!%p718_p0), %s144_s30, 128, %s146_s4, %s134_s6, %s624_s18, %s624_s18, %s625_s19  }
  0x24   : > { %p171_p3 = scmp.lt.s32.totalorder %s621_s14, 3  ;;  %s391_s20 = sshll.u32 %s617_s13, 4 }
  0x25   : > { %s164_s29 = scalar_lea.hbm %s808_s1, %s391_s20  ;;  %s158_s3 = scalar_lea.vmem [#allocation6], %s709_s25 }
  0x26   : > { %p735_p5 = pnand %p392_p1, %p171_p3  ;;  %s166_s7 = sshll.u32 %s158_s3, 4  ;;  %s167_s7 = int_to_ptr.vmem [resolvable:$true] %s166_s7 }
  0x27   : > { %s156_s8 = scalar_lea.sflag [#allocation7], %s709_s25  ;;  %s522_s15 = scalar_lea.vmem %s167_s7, 16 }
  0x28   : > { %p523_p6 = scmp.ne.s32.totalorder %s167_s7, %s522_s15  ;;  %s626_s30 = smov [#allocation6]  }
  0x29   : > { %s527_s4 = sshll.u32 %s626_s30, 4  ;;  %s528_s4 = int_to_ptr.vmem [resolvable:$false] %s527_s4 }
  0x2a   : > { %p525_p4 = pnand %p523_p6, %p483_p2  ;;  %s529_s6 = scalar_lea.vmem %s528_s4, 32 }
  0x2b   : > { %p530_p1 = scmp.lt.s32.totalorder %s167_s7, %s528_s4  ;;  %p531_p10 = scmp.lt.s32.totalorder %s529_s6, %s522_s15 }
  0x2c   : > { %p526_p7 = pneg %p525_p4 }
  0x2d   : > { %p532_p13 = por %p531_p10, %p530_p1 }
  0x2f   : > { %p533_p3 = pnand %p532_p13, %p526_p7 }
  0x31   : > { %536 = shalt.err (!%p533_p3)
}
  0x32   : > { %413 = dma.hbm_to_vmem [thread:$0]  (!%p718_p0), %s164_s29, 16, %s167_s7, %s156_s8  }
  0x33   : > { %175 = sbr.rel (%p735_p5) target bundleno = 143 (0x8f), region = 28  ;;  %s752_s25 = sand.u32 (!%p735_p5), 1, %s605_s10  }
  0x34   : > { %s393_s16 = sshll.u32 (!%p735_p5), %s752_s25, 3  ;;  %s178_s18 = scalar_lea.sflag (!%p735_p5), [#allocation4], %s752_s25 }
  0x35   : > { %s181_s19 = scalar_lea.vmem (!%p735_p5), [#allocation3], %s393_s16 }
  0x38   : > { %588 = dma.done.wait (%p691_p8), %s178_s18, 128  }
  0x39   : > { %590 = vsyncadd (%p691_p8), %s178_s18, 4294967168  ;;  %s187_s5 = scalar_lea.sflag [#allocation7], %s752_s25  ;;  %s189_s20 = scalar_lea.vmem [#allocation6], %s752_s25 }
  0x3a   : > { %592 = dma.done.wait (%p691_p8), %s187_s5, 16  }
  0x3b   : > { %594 = vsyncadd (%p691_p8), %s187_s5, 4294967280  ;;  %v627_v0 = vmov 0.0   ;;  %v220_v1 = vld [vmem:[%s181_s19] sm:$0x3]  ;;  %v394_v2 = vld [vmem:[%s181_s19 + $0x2] sm:$0x3] }
  0x3c   : > { %217 = vst [vmem:[#allocation2] sm:$0x3] %v627_v0  ;;  %v223_v3 = vmax.f32 %v220_v1, %v394_v2  ;;  %v395_v4 = vld [vmem:[%s181_s19 + $0x4] sm:$0x3]  ;;  %v396_v5 = vld [vmem:[%s181_s19 + $0x6] sm:$0x3] }
  0x3d   : > { %v218_v16 = vld [vmem:[%s189_s20] sm:$0x1]  ;;  %vm265_vm4 = vcmask 1041408   ;;  %s212_s21 = scalar_lea.vmem [#allocation8], %s752_s25  ;;  %s397_s27 = sshll.u32 %s613_s12, 4 }
  0x3e   : > { %v226_v6 = vmax.f32 %v223_v3, %v395_v4  ;;  %v219_v18 = vunpack.c.0.s8 %v218_v16  ;;  %s287_s26 = sshll.u32 %s212_s21, 4  ;;  %s285_s3 = scalar_lea.hbm %s809_s2, %s397_s27  ;;  %s288_s26 = int_to_ptr.vmem [resolvable:$true] %s287_s26 }
  0x3f   : > { %s275_s7 = scalar_lea.sflag [#allocation5], %s752_s25  ;;  %s537_s8 = scalar_lea.vmem %s288_s26, 16 }
  0x40   : > { %v229_v7 = vmax.f32 %v226_v6, %v396_v5  ;;  %vm233_vm0 = vcmp.eq.s32.totalorder %v219_v18, 0  ;;  %vm239_vm1 = vcmp.eq.s32.totalorder %v219_v18, 1  ;;  %vm246_vm2 = vcmp.eq.s32.totalorder %v219_v18, 2  ;;  %p538_p8 = scmp.ne.s32.totalorder %s288_s26, %s537_s8  ;;  %s628_s15 = smov [#allocation8]  }
  0x41   : > { %vm253_vm3 = vcmp.eq.s32.totalorder %v219_v18, 3  ;;  %s541_s30 = sshll.u32 %s628_s15, 4  ;;  %s542_s30 = int_to_ptr.vmem [resolvable:$false] %s541_s30 }
  0x42   : > { %v230_v8 = vsub.f32 %v220_v1, %v229_v7  ;;  %v235_v9 = vsub.f32 %v394_v2, %v229_v7  ;;  %v242_v10 = vsub.f32 %v395_v4, %v229_v7  ;;  %v249_v11 = vsub.f32 %v396_v5, %v229_v7  ;;  %p539_p0 = pnand %p538_p8, %p695_p9  ;;  %s543_s4 = scalar_lea.vmem %s542_s30, 32 }
  0x43   : > { %v258_v33 = vld [vmem:[#allocation2] sm:$0x3]  ;;  %p544_p5 = scmp.lt.s32.totalorder %s288_s26, %s542_s30  ;;  %p545_p6 = scmp.lt.s32.totalorder %s543_s4, %s537_s8 }
  0x44   : > { %v231_v12 = vmul.f32 1.442695, %v230_v8  ;;  %v236_v13 = vmul.f32 1.442695, %v235_v9  ;;  %v243_v14 = vmul.f32 1.442695, %v242_v10  ;;  %p540_p2 = pneg %p539_p0 }
  0x45   : > { %v250_v15 = vmul.f32 1.442695, %v249_v11  ;;  %p546_p4 = por %p545_p6, %p544_p5 }
  0x46   : > { %471 = vpow2.f32 %v231_v12 }
  0x47   : > { %473 = vpow2.f32 %v236_v13  ;;  %p547_p7 = pnand %p546_p4, %p540_p2 }
  0x48   : > { %475 = vpow2.f32 %v243_v14 }
  0x49   : > { %477 = vpow2.f32 %v250_v15 }
  0x53   : > { %v472_v17 = vpop.eup %471 }
  0x54   : > { %v474_v19 = vpop.eup %473  ;;  %v234_v25 = vsel %vm233_vm0, %v472_v17, 0.0 }
  0x55   : > { %v476_v20 = vpop.eup %475  ;;  %v238_v21 = vadd.f32 %v474_v19, %v472_v17  ;;  %v240_v26 = vsel %vm239_vm1, %v474_v19, 0.0 }
  0x56   : > { %v478_v22 = vpop.eup %477  ;;  %v241_v27 = vadd.f32 %v240_v26, %v234_v25  ;;  %v247_v28 = vsel %vm246_vm2, %v476_v20, 0.0 }
  0x57   : > { %v245_v23 = vadd.f32 %v476_v20, %v238_v21  ;;  %v254_v30 = vsel %vm253_vm3, %v478_v22, 0.0 }
  0x58   : > { %v248_v29 = vadd.f32 %v247_v28, %v241_v27 }
  0x59   : > { %v252_v24 = vadd.f32 %v478_v22, %v245_v23 }
  0x5a   : > { %v255_v31 = vadd.f32 %v254_v30, %v248_v29 }
  0x5b   : > { %479 = vrcp.f32 %v252_v24 }
  0x68   : > { %v480_v32 = vpop.eup %479 }
  0x69   : > { %v257_v34 = vmul.f32 %v480_v32, %v255_v31 }
  0x6b   : > { %v259_v35 = vadd.f32 %v258_v33, %v257_v34 }
  0x6d   : > { %260 = vst [vmem:[#allocation2] sm:$0x3] %v259_v35 }
  0x74   : > { %v264_v36 = vld [vmem:[#allocation2] sm:$0x3] }
  0x75   : > { %v266_v37 = vsel %vm265_vm4, %v264_v36, 0.0 }
  0x76   : > { %v267_v38 = vrot.slane %v266_v37, 4 }
  0x78   : > { %v268_v39 = vadd.f32 %v267_v38, %v266_v37 }
  0x7a   : > { %v269_v40 = vrot.slane %v268_v39, 2 }
  0x7c   : > { %v270_v41 = vadd.f32 %v269_v40, %v268_v39 }
  0x7e   : > { %v271_v42 = vrot.slane %v270_v41, 1 }
  0x80   : > { %v272_v43 = vadd.f32 %v271_v42, %v270_v41 }
  0x82   : > { %273 = vst [vmem:[%s212_s21] sm:$0x1] %v272_v43 }
  0x83   : > { %550 = shalt.err (!%p547_p7)
}
  0x84   : > { %s551_s12 = scalar_lea.hbm %s285_s3, 16  ;;  %s555_s16 = scalar_lea.hbm %s809_s2, 32 }
  0x85   : > { %p552_p1 = scmp.ne.s32.totalorder %s285_s3, %s551_s12  ;;  %p556_p3 = scmp.lt.s32.totalorder %s285_s3, %s809_s2 }
  0x86   : > { %p557_p8 = scmp.lt.s32.totalorder %s555_s16, %s551_s12 }
  0x87   : > { %p553_p10 = pnand %p552_p1, %p695_p9 }
  0x88   : > { %p558_p0 = por %p557_p8, %p556_p3 }
  0x89   : > { %p554_p13 = pneg %p553_p10 }
  0x8b   : > { %p559_p12 = pnand %p558_p0, %p554_p13 }
  0x8d   : > { %562 = shalt.err (!%p559_p12)
}
  0x8e   : > { %405 = dma.vmem_to_hbm [thread:$0]  (%p695_p9), %s288_s26, 16, %s285_s3, %s275_s7  }
  0x8f PF: > { %s299_s5 = sand.u32 1, %s601_s9   ;;  %p816_p2 = scmp.ge.s32.totalorder %s621_s14, 2 }
  0x90   : > { %s300_s20 = scalar_lea.sflag [#allocation5], %s299_s5 }
  0x91   : > { %p415_p5 = pnand %p816_p2, %p702_p11 }
  0x93   : > { %p416_p6 = pneg %p415_p5 }
  0x95   : > { %596 = dma.done.wait (%p416_p6), %s300_s20, 16  }
  0x96   : > { %598 = vsyncadd (%p416_p6), %s300_s20, 4294967280  ;;  %s21_s14 = sadd.s32 1, %s621_s14   ;;  %s817_s9 = smov %s605_s10 }
  0x97   : > { %p18_p4 = scmp.ge.s32.totalorder %s21_s14, 4   ;;  %s818_s10 = smov %s609_s11 }
  0x98   : > { %s819_s11 = smov %s700_s23  ;;  %s820_s12 = smov %s617_s13 }
  0x99   : > { %s821_s13 = smov %s823_s17  ;;  %20 = sbr.rel (!%p18_p4) target bundleno = 8 (0x8), region = 97 }
  0x9e   :  { %304 = vsyncpa [#allocation4], 1 }
  0x9f   :  { %306 = vsyncpa [#allocation4 + $0x1], 1 }
  0xa0   :  { %307 = vsyncpa [#allocation7], 1 }
  0xa1   :  { %309 = vsyncpa [#allocation7 + $0x1], 1 }
  0xa2   :  { %310 = vsyncpa [#allocation5], 1 }
  0xa3   :  { %312 = vsyncpa [#allocation5 + $0x1], 1 }

</bundles_post_ra>
